<compile_context>
chip_gen: v6e
topology: v6e:2x2x1
jax: 0.10.0
libtpu: 0.0.40
codegen_flags: <defaults>
</compile_context>

<pallas_src>
import functools

import jax
import jax.numpy as jnp
from jax import lax
from jax.experimental import pallas as pl
from jax.experimental.pallas import tpu as pltpu

_VMEM_LIMIT = 32 * 1024 * 1024  # explicit scoped-VMEM budget, safe on v5e/v6e/v7x


def _tile(dim, pref):
    """Largest tile <= pref that evenly divides dim (falls back to full dim)."""
    pref = min(pref, dim)
    return pref if dim % pref == 0 else dim


# --------------------------- tiled / pipelined matmul ---------------------------

def _matmul_kernel(x_ref, w_ref, o_ref, acc_ref):
    # TODO(synk): optionally cast x/w to bf16 (f32 accumulate) for higher MXU
    # throughput on v6e/v7x; kept f32 here to preserve strict numerics.
    @pl.when(pl.program_id(2) == 0)
    def _():
        acc_ref[...] = jnp.zeros_like(acc_ref)

    acc_ref[...] += jnp.dot(x_ref[...], w_ref[...],
                            preferred_element_type=jnp.float32)

    @pl.when(pl.program_id(2) == pl.num_programs(2) - 1)
    def _():
        o_ref[...] = acc_ref[...].astype(o_ref.dtype)


def pallas_matmul(x2d, w, *, tm=128, tn=128, tk=256):
    """y = x2d @ w, tiled + pipelined (bias-free: used for the KV projection)."""
    M, K = x2d.shape
    K2, N = w.shape
    assert K == K2
    tm, tn, tk = _tile(M, tm), _tile(N, tn), _tile(K, tk)
    grid = (M // tm, N // tn, K // tk)
    return pl.pallas_call(
        _matmul_kernel,
        out_shape=jax.ShapeDtypeStruct((M, N), x2d.dtype),
        grid=grid,
        in_specs=[
            pl.BlockSpec((tm, tk), lambda i, j, k: (i, k)),
            pl.BlockSpec((tk, tn), lambda i, j, k: (k, j)),
        ],
        out_specs=pl.BlockSpec((tm, tn), lambda i, j, k: (i, j)),
        scratch_shapes=[pltpu.VMEM((tm, tn), jnp.float32)],
        compiler_params=pltpu.CompilerParams(
            dimension_semantics=("parallel", "parallel", "arbitrary"),
            vmem_limit_bytes=_VMEM_LIMIT,
        ),
    )(x2d, w)


# ------------------ fused Q-proj + flash attention + out-proj -------------------

def _fused_attention_kernel(x_ref, kv_ref, wq_ref, wo_ref, bo_ref, o_ref,
                            q_s, acc_s, m_s, l_s, *, heads, dim_head, scale):
    # x_ref:  (1, tq, Dq)     current (batch, q-tile) block of the input
    # kv_ref: (1, tkv, 2*H*d) current KV-projection chunk (k columns | v columns)
    # wq_ref: (H, Dq, d)      per-head q weights
    # wo_ref: (H, d, Dq)      per-head output weights
    # bo_ref: (1, Dq)         output bias
    ki = pl.program_id(2)
    inner = heads * dim_head

    @pl.when(ki == 0)
    def _():
        x = x_ref[0]                                                  # (tq, Dq)
        for h in range(heads):
            # Fold the softmax scale into q once (tq*d muls, not tq*tkv).
            q_s[h] = jnp.dot(x, wq_ref[h],
                             preferred_element_type=jnp.float32) * scale
        m_s[...] = jnp.full_like(m_s, -jnp.inf)
        l_s[...] = jnp.zeros_like(l_s)
        acc_s[...] = jnp.zeros_like(acc_s)

    # Online-softmax update against the current streamed KV chunk, per head.
    for h in range(heads):
        k_h = kv_ref[0, :, h * dim_head:(h + 1) * dim_head]           # (tkv, d)
        v_h = kv_ref[0, :, inner + h * dim_head: inner + (h + 1) * dim_head]
        # Contract on the last dim of both operands -> no k.T / XLU transpose.
        s = lax.dot_general(q_s[h], k_h, (((1,), (1,)), ((), ())),
                            preferred_element_type=jnp.float32)       # (tq, tkv)
        m_prev = m_s[h]                                                # (tq, 1)
        m_new = jnp.maximum(m_prev, jnp.max(s, axis=-1, keepdims=True))
        alpha = jnp.exp(m_prev - m_new)
        p = jnp.exp(s - m_new)
        l_s[h] = alpha * l_s[h] + jnp.sum(p, axis=-1, keepdims=True)
        acc_s[h] = alpha * acc_s[h] + jnp.dot(p, v_h,
                                              preferred_element_type=jnp.float32)
        m_s[h] = m_new

    @pl.when(ki == pl.num_programs(2) - 1)
    def _():
        res = bo_ref[...]                                              # (1, Dq)
        for h in range(heads):
            o_h = acc_s[h] * pl.reciprocal(l_s[h], approx=True)        # (tq, d)
            res = res + jnp.dot(o_h, wo_ref[h],
                                preferred_element_type=jnp.float32)    # (tq, Dq)
        o_ref[0] = res.astype(o_ref.dtype)


def flash_attention_fused(x, kv, wq_h, wo_h, bo, *, heads, dim_head, scale,
                          tq=128, tkv=128):
    """x: (B, Nq, Dq), kv: (B, Nk, 2*H*d)  ->  (B, Nq, Dq)."""
    B, Nq, Dq = x.shape
    _, Nk, two_inner = kv.shape
    inner = heads * dim_head
    assert two_inner == 2 * inner
    tq, tkv = _tile(Nq, tq), _tile(Nk, tkv)
    grid = (B, Nq // tq, Nk // tkv)
    kernel = functools.partial(_fused_attention_kernel, heads=heads,
                               dim_head=dim_head, scale=scale)
    return pl.pallas_call(
        kernel,
        out_shape=jax.ShapeDtypeStruct((B, Nq, Dq), x.dtype),
        grid=grid,
        in_specs=[
            pl.BlockSpec((1, tq, Dq), lambda b, qi, ki: (b, qi, 0)),
            pl.BlockSpec((1, tkv, 2 * inner), lambda b, qi, ki: (b, ki, 0)),
            pl.BlockSpec((heads, Dq, dim_head), lambda b, qi, ki: (0, 0, 0)),
            pl.BlockSpec((heads, dim_head, Dq), lambda b, qi, ki: (0, 0, 0)),
            pl.BlockSpec((1, Dq), lambda b, qi, ki: (0, 0)),
        ],
        out_specs=pl.BlockSpec((1, tq, Dq), lambda b, qi, ki: (b, qi, 0)),
        scratch_shapes=[
            pltpu.VMEM((heads, tq, dim_head), jnp.float32),  # pre-scaled q
            pltpu.VMEM((heads, tq, dim_head), jnp.float32),  # unnormalized acc
            pltpu.VMEM((heads, tq, 1), jnp.float32),         # running max
            pltpu.VMEM((heads, tq, 1), jnp.float32),         # running sum
        ],
        compiler_params=pltpu.CompilerParams(
            dimension_semantics=("parallel", "parallel", "arbitrary"),
            vmem_limit_bytes=_VMEM_LIMIT,
        ),
    )(x, kv, wq_h, wo_h, bo)


# --------------------------------- full forward ---------------------------------

def attention_forward(x, params, *, heads, dim_head, context=None):
    """Replicates Attention.forward (mask=None path).

    x:       (B, Nq, query_dim)
    context: (B, Nk, context_dim) or None (-> self-attention on x)
    """
    # TODO(synk): optional boolean `mask` path (masked_fill with -finfo.max) not implemented.
    B, Nq, Dq = x.shape
    ctx = x if context is None else context
    _, Nk, Dc = ctx.shape
    inner = heads * dim_head
    scale = float(dim_head) ** -0.5

    # KV projection: one tiled matmul; output stays in the natural lane-dense
    # (B, Nk, 2*inner) layout — no chunk / transpose HBM round-trips.
    kv = pallas_matmul(ctx.reshape(B * Nk, Dc), params["wkv"]).reshape(B, Nk, 2 * inner)

    # Per-head weight re-layouts: tiny one-time ops on parameters, not activations.
    wq_h = params["wq"].reshape(Dq, heads, dim_head).transpose(1, 0, 2)  # (H, Dq, d)
    wo_h = params["wo"].reshape(heads, dim_head, Dq)                     # (H, d, Dq)
    bo = params["bo"].reshape(1, Dq)

    # Fused: Q projection + flash attention (streamed KV) + output projection.
    return flash_attention_fused(x, kv, wq_h, wo_h, bo,
                                 heads=heads, dim_head=dim_head, scale=scale)


# ---------------------------------- reference -----------------------------------

def attention_reference(x, params, *, heads, dim_head, context=None):
    B, Nq, query_dim = x.shape
    ctx = x if context is None else context
    inner = heads * dim_head
    scale = float(dim_head) ** -0.5
    q = x @ params["wq"]
    kv = ctx @ params["wkv"]
    k, v = kv[..., :inner], kv[..., inner:]
    q = q.reshape(B, Nq, heads, dim_head).transpose(0, 2, 1, 3)
    k = k.reshape(B, -1, heads, dim_head).transpose(0, 2, 1, 3)
    v = v.reshape(B, -1, heads, dim_head).transpose(0, 2, 1, 3)
    sim = jnp.einsum("bhid,bhjd->bhij", q, k) * scale
    attn = jax.nn.softmax(sim, axis=-1)
    out = jnp.einsum("bhij,bhjd->bhid", attn, v)
    out = out.transpose(0, 2, 1, 3).reshape(B, Nq, inner)
    return out @ params["wo"] + params["bo"]


# ------------------------------------- main --------------------------------------

if __name__ == "__main__":
    # small, module-consistent shapes
    B, N = 2, 8
    query_dim = 32
    heads, dim_head = 2, 16
    inner = heads * dim_head
    context_dim = query_dim  # self-attention (context defaults to x)

    key = jax.random.PRNGKey(0)
    kx, kq, kkv, kwo, kbo = jax.random.split(key, 5)

    x = jax.random.normal(kx, (B, N, query_dim), dtype=jnp.float32)

    # torch Linear weight is (out, in); we store the transposed (in, out) form.
    params = {
        "wq": 0.05 * jax.random.normal(kq, (query_dim, inner), dtype=jnp.float32),
        "wkv": 0.05 * jax.random.normal(kkv, (context_dim, 2 * inner), dtype=jnp.float32),
        "wo": 0.05 * jax.random.normal(kwo, (inner, query_dim), dtype=jnp.float32),
        "bo": 0.05 * jax.random.normal(kbo, (query_dim,), dtype=jnp.float32),
    }

    out = attention_forward(x, params, heads=heads, dim_head=dim_head)
    out = jax.block_until_ready(out)

    ref = attention_reference(x, params, heads=heads, dim_head=dim_head)
    assert out.shape == (B, N, query_dim)
    assert jnp.allclose(out, ref, atol=1e-3, rtol=1e-3), "mismatch vs reference"

    print("KERNEL_OK")
</pallas_src>

<mosaic_0001>
module attributes {stable_mosaic.version = 11 : i64} {
  func.func @_matmul_kernel(%arg0: i32, %arg1: i32, %arg2: i32, %arg3: memref<16x32xf32, #tpu.memory_space<vmem>>, %arg4: memref<32x64xf32, #tpu.memory_space<vmem>>, %arg5: memref<16x64xf32, #tpu.memory_space<vmem>>, %arg6: memref<16x64xf32, #tpu.memory_space<vmem>>) attributes {dimension_semantics = [#tpu.dimension_semantics<parallel>, #tpu.dimension_semantics<parallel>, #tpu.dimension_semantics<arbitrary>], iteration_bounds = array<i64: 1, 1, 1>, scalar_prefetch = 0 : i64, scratch_operands = 1 : i64, tpu.core_type = #tpu.core_type<tc>, window_params = [{transform_indices = @transform_0, window_bounds = array<i64: 16, 32>}, {transform_indices = @transform_1, window_bounds = array<i64: 32, 64>}, {transform_indices = @transform_2, window_bounds = array<i64: 16, 64>}]} {
    %c0_i32 = arith.constant 0 : i32
    %0 = arith.cmpi eq, %arg2, %c0_i32 : i32
    %1 = arith.extui %0 : i1 to i32
    %c0_i32_0 = arith.constant 0 : i32
    %2 = arith.cmpi ne, %1, %c0_i32_0 : i32
    scf.if %2 {
      %cst_10 = arith.constant 0.000000e+00 : f32
      %12 = vector.broadcast %cst_10 : f32 to vector<16x64xf32>
      %c0_11 = arith.constant 0 : index
      %c0_12 = arith.constant 0 : index
      %13 = vector.load %arg6[%c0_11, %c0_12] : memref<16x64xf32, #tpu.memory_space<vmem>>, vector<16x64xf32>
      tpu.vector_store %arg6[%c0_11, %c0_12], %12 {strides = array<i32>} : memref<16x64xf32, #tpu.memory_space<vmem>>, vector<16x64xf32>,
    } else {
    }
    %c0 = arith.constant 0 : index
    %c0_1 = arith.constant 0 : index
    %3 = vector.load %arg6[%c0, %c0_1] : memref<16x64xf32, #tpu.memory_space<vmem>>, vector<16x64xf32>
    %c0_2 = arith.constant 0 : index
    %c0_3 = arith.constant 0 : index
    %4 = vector.load %arg3[%c0_2, %c0_3] : memref<16x32xf32, #tpu.memory_space<vmem>>, vector<16x32xf32>
    %c0_4 = arith.constant 0 : index
    %c0_5 = arith.constant 0 : index
    %5 = vector.load %arg4[%c0_4, %c0_5] : memref<32x64xf32, #tpu.memory_space<vmem>>, vector<32x64xf32>
    %cst = arith.constant dense<0.000000e+00> : vector<16x64xf32>
    %6 = tpu.matmul %4, %5, %cst {dimension_numbers = #tpu.dot_dimension_numbers<[1], [0], [0], [1], [0, 0, 1, 1], [], []>} : vector<16x32xf32>, vector<32x64xf32>, vector<16x64xf32> -> vector<16x64xf32>
    %7 = arith.addf %3, %6 : vector<16x64xf32>
    %c0_6 = arith.constant 0 : index
    %c0_7 = arith.constant 0 : index
    %8 = vector.load %arg6[%c0_6, %c0_7] : memref<16x64xf32, #tpu.memory_space<vmem>>, vector<16x64xf32>
    tpu.vector_store %arg6[%c0_6, %c0_7], %7 {strides = array<i32>} : memref<16x64xf32, #tpu.memory_space<vmem>>, vector<16x64xf32>,
    %c0_i32_8 = arith.constant 0 : i32
    %9 = arith.cmpi eq, %arg2, %c0_i32_8 : i32
    %10 = arith.extui %9 : i1 to i32
    %c0_i32_9 = arith.constant 0 : i32
    %11 = arith.cmpi ne, %10, %c0_i32_9 : i32
    scf.if %11 {
      %c0_10 = arith.constant 0 : index
      %c0_11 = arith.constant 0 : index
      %12 = vector.load %arg6[%c0_10, %c0_11] : memref<16x64xf32, #tpu.memory_space<vmem>>, vector<16x64xf32>
      %c0_12 = arith.constant 0 : index
      %c0_13 = arith.constant 0 : index
      %13 = vector.load %arg5[%c0_12, %c0_13] : memref<16x64xf32, #tpu.memory_space<vmem>>, vector<16x64xf32>
      tpu.vector_store %arg5[%c0_12, %c0_13], %12 {strides = array<i32>} : memref<16x64xf32, #tpu.memory_space<vmem>>, vector<16x64xf32>,
    } else {
    }
    return
  }
  func.func @transform_0(%arg0: i32, %arg1: i32, %arg2: i32) -> (i32, i32) {
    %c0_i32 = arith.constant 0 : i32
    return %arg0, %arg2 : i32, i32
  }
  func.func @transform_1(%arg0: i32, %arg1: i32, %arg2: i32) -> (i32, i32) {
    %c0_i32 = arith.constant 0 : i32
    return %arg2, %arg1 : i32, i32
  }
  func.func @transform_2(%arg0: i32, %arg1: i32, %arg2: i32) -> (i32, i32) {
    %c0_i32 = arith.constant 0 : i32
    return %arg0, %arg1 : i32, i32
  }
}

</mosaic_0001>

<bundles_post_ra>
// kernel: tpu_custom_call.1
= control target key start
LH: loop header
LB: loop body
LE: loop exit
PB: predicated region body
PF: predicated region fallthrough
CT: control target
= control target key end

     0   :  { %7 = vsyncpa [#allocation4], 0  ;;  %s305_s0 = inlined_call_operand.hbm [shape: f32[16,32], index: 0, kind: input, shape index: {}]   ;;  %s306_s1 = inlined_call_operand.hbm [shape: f32[32,64], index: 1, kind: input, shape index: {}]   ;;  %s307_s2 = inlined_call_operand.hbm [shape: f32[16,64], index: 2, kind: output, shape index: {}]  }
   0x1   :  { %8 = vsyncpa [#allocation7], 0 }
   0x2   :  { %9 = vsyncpa [#allocation5], 0  ;;  %s258_s9 = smov [#allocation3]  }
   0x3   :  { %s15_s10 = sshll.u32 %s258_s9, 4  ;;  %s16_s10 = int_to_ptr.vmem [resolvable:$true] %s15_s10 }
   0x4   :  { %s200_s11 = scalar_lea.vmem %s16_s10, 256  ;;  %p205_p1 = scmp.lt.s32.totalorder %s16_s10, %s16_s10 }
   0x5   :  { %p201_p0 = scmp.ne.s32.totalorder %s16_s10, %s200_s11  ;;  %p206_p2 = scmp.lt.s32.totalorder %s200_s11, %s200_s11 }
   0x7   :  { %p207_p3 = por %p206_p2, %p205_p1 }
   0x9   :  { %p208_p4 = pnand %p207_p3, %p201_p0 }
   0xb   :  { %211 = shalt.err (!%p208_p4)
}
   0xc   :  { %s259_s12 = smov 128   ;;  %s260_s13 = smov 8  }
   0xd   :  { %21 = dma.hbm_to_vmem [thread:$0]  %s305_s0, 256, %s16_s10, [#allocation4], %s259_s12, %s259_s12, %s260_s13  }
   0xe   :  { %s261_s16 = smov [#allocation6]  }
   0xf   :  { %s27_s17 = sshll.u32 %s261_s16, 4  ;;  %s28_s17 = int_to_ptr.vmem [resolvable:$true] %s27_s17 }
  0x10   :  { %s220_s18 = scalar_lea.vmem %s28_s17, 512  ;;  %p225_p6 = scmp.lt.s32.totalorder %s28_s17, %s28_s17 }
  0x11   :  { %p221_p5 = scmp.ne.s32.totalorder %s28_s17, %s220_s18  ;;  %p226_p7 = scmp.lt.s32.totalorder %s220_s18, %s220_s18 }
  0x13   :  { %p227_p8 = por %p226_p7, %p225_p6 }
  0x15   :  { %p228_p9 = pnand %p227_p8, %p221_p5 }
  0x17   :  { %231 = shalt.err (!%p228_p9)
}
  0x18   :  { %33 = dma.hbm_to_vmem [thread:$0]  %s306_s1, 512, %s28_s17, [#allocation7], %s259_s12, %s259_s12, %s260_s13  }
  0x19   :  { %252 = dma.done.wait [#allocation4], 256  }
  0x1a   :  { %253 = vsyncadd [#allocation4], 4294967040 }
  0x1b   :  { %254 = dma.done.wait [#allocation7], 512  }
  0x1c   :  { %255 = vsyncadd [#allocation7], 4294966784  ;;  %vm44_vm0 = vcmask 523264   ;;  %v262_v0 = vmov 0.0   ;;  %vm55_vm1 = vcmask 261120   ;;  %v54_v1 = vld [vmem:[#allocation6 + $0x18] sm:$0xff] }
  0x1d   :  { %46 = vst.msk [vmem:[#allocation2 + $0x8] sm:$0xff] %vm44_vm0, %v262_v0  ;;  %45 = vst.msk [vmem:[#allocation2] sm:$0xff] %vm44_vm0, %v262_v0  ;;  %v53_v2 = vld [vmem:[#allocation6 + $0x10] sm:$0xff]  ;;  %175 = vmatprep.subr.mxu0 %v54_v1  ;;  %v52_v4 = vld [vmem:[#allocation6 + $0x8] sm:$0xff]  ;;  %s263_s0 = smov [#allocation8]  }
  0x1e   :  { %v49_v3 = vld [vmem:[#allocation3] sm:$0xff]  ;;  %176 = vmatpush3.msra.mxu0 %v54_v1  ;;  %v51_v5 = vld [vmem:[#allocation6] sm:$0xff]  ;;  %v50_v6 = vld [vmem:[#allocation3 + $0x8] sm:$0xff]  ;;  %s154_s1 = sshll.u32 %s263_s0, 4  ;;  %s155_s1 = int_to_ptr.vmem [resolvable:$true] %s154_s1 }
  0x1f   :  { %183 = vmatprep.mubr.msk.f32.mxu0 %vm55_vm1, %v49_v3  ;;  %177 = vmatprep.subr.mxu0 %v53_v2  ;;  %s232_s21 = scalar_lea.vmem %s155_s1, 256  ;;  %p237_p11 = scmp.lt.s32.totalorder %s155_s1, %s155_s1 }
  0x20   :  { %178 = vmatpush3.msra.mxu0 %v53_v2  ;;  %p233_p10 = scmp.ne.s32.totalorder %s155_s1, %s232_s21  ;;  %p238_p12 = scmp.lt.s32.totalorder %s232_s21, %s232_s21 }
  0x21   :  { %179 = vmatprep.subr.mxu0 %v52_v4 }
  0x22   :  { %180 = vmatpush3.msra.mxu0 %v52_v4  ;;  %p239_p13 = por %p238_p12, %p237_p11 }
  0x23   :  { %181 = vmatprep.subr.mxu0 %v51_v5 }
  0x24   :  { %182 = vmatpush3.msra.mxu0 %v51_v5  ;;  %v48_v7 = vld [vmem:[#allocation2 + $0x8] sm:$0xff]  ;;  %v47_v9 = vld [vmem:[#allocation2] sm:$0xff]  ;;  %p240_p0 = pnand %p239_p13, %p233_p10 }
  0x25   :  { %184 = vmatmul.mubr.msk.f32.vlgmr.msra.gmra.mxu0 %vm55_vm1, %v50_v6 }
  0xe5   :  { %v185_v8 = vpop.f32.mrf.mxu0 }
  0xe6   :  { %v138_v10 = vadd.f32 %v185_v8, %v48_v7 }
  0xe7   :  { %v128_v11 = vpop.f32.mrf.mxu0 }
  0xe8   :  { %141 = vst.msk [vmem:[#allocation2 + $0x8] sm:$0xff] %vm44_vm0, %v138_v10  ;;  %v137_v12 = vadd.f32 %v128_v11, %v47_v9 }
  0xea   :  { %140 = vst.msk [vmem:[#allocation2] sm:$0xff] %vm44_vm0, %v137_v12 }
  0xef   :  { %v146_v13 = vld [vmem:[#allocation2 + $0x8] sm:$0xff] }
  0xf0   :  { %148 = vst.msk [vmem:[#allocation8 + $0x8] sm:$0xff] %vm44_vm0, %v146_v13 }
  0xf1   :  { %v145_v14 = vld [vmem:[#allocation2] sm:$0xff] }
  0xf2   :  { %147 = vst.msk [vmem:[#allocation8] sm:$0xff] %vm44_vm0, %v145_v14 }
  0xf3   :  { %243 = shalt.err (!%p240_p0)
}
  0xf4   :  { %160 = dma.vmem_to_hbm [thread:$0]  %s155_s1, 256, %s307_s2, [#allocation5], %s259_s12, %s259_s12, %s260_s13  }
  0xf5   :  { %256 = dma.done.wait [#allocation5], 256  }
  0xf6   :  { %257 = vsyncadd [#allocation5], 4294967040 }
  0xf7   :  { %164 = vsyncpa [#allocation4], 1 }
  0xf8   :  { %165 = vsyncpa [#allocation7], 1 }
  0xf9   :  { %166 = vsyncpa [#allocation5], 1 }

</bundles_post_ra>
